<compile_context>
chip_gen: v6e
topology: v6e:2x2x1
jax: 0.10.0
libtpu: 0.0.40
codegen_flags: <defaults>
</compile_context>

<pallas_src>
import math

import jax
import jax.numpy as jnp
from jax.experimental import pallas as pl
from jax.experimental.pallas import tpu as pltpu


def _round_up(x: int, m: int) -> int:
    return ((x + m - 1) // m) * m


def _pad2d(a, rows, cols):
    pr, pc = rows - a.shape[0], cols - a.shape[1]
    if pr == 0 and pc == 0:
        return a
    return jnp.pad(a, ((0, pr), (0, pc)))


def _device_budget():
    """Return (lane_multiple, physical_vmem_bytes) for the current TPU gen.

    Conservative fallback (128-lane padding, 64 MiB VMEM) if detection fails.
    """
    lane_mult, phys_mib = 128, 64
    try:
        kind = jax.devices()[0].device_kind.lower()
        if "v5" in kind:
            lane_mult, phys_mib = 128, 128   # 128-wide MXU, 128 MiB VMEM
        elif "v6" in kind:
            lane_mult, phys_mib = 256, 128   # 256-wide MXU, 128 MiB VMEM
        elif "v7" in kind:
            lane_mult, phys_mib = 256, 64    # 256-wide MXU, 64 MiB VMEM/TC
    except Exception:
        pass
    return lane_mult, phys_mib * 1024 * 1024


def _classification_kernel(x_ref, w_ref, t_ref, out_ref, feat_acc):
    # x_ref:     (tb, tk)        bf16  flattened-image tile
    # w_ref:     (tk, D_pad)     bf16  encode_image projection tile
    # t_ref:     (D_pad, N_pad)  bf16  text embedding matrix (resident)
    # out_ref:   (tb, N_pad)     f32   logits tile
    # feat_acc:  (tb, D_pad)     f32   VMEM accumulator for image features
    k = pl.program_id(1)

    @pl.when(k == 0)
    def _():
        feat_acc[...] = jnp.zeros_like(feat_acc)

    # encode_image partial product: accumulate feature tile in f32 on the MXU.
    feat_acc[...] += jnp.dot(x_ref[...], w_ref[...],
                             preferred_element_type=jnp.float32)

    @pl.when(k == pl.num_programs(1) - 1)
    def _():
        feats = feat_acc[...]                                      # (tb, D_pad) f32
        # L2 normalization along the feature dim, in f32 (VPU/EUP).
        sq_norm = jnp.sum(feats * feats, axis=-1, keepdims=True)   # (tb, 1)
        # eps only guards exactly-zero rows (zero-padded batch rows); PyTorch
        # would yield inf/nan there.
        inv_norm = jax.lax.rsqrt(jnp.maximum(sq_norm, 1e-12))
        feats_n = (feats * inv_norm).astype(t_ref.dtype)           # bf16 for MXU
        logits = jnp.dot(feats_n, t_ref[...],
                         preferred_element_type=jnp.float32)
        # Apply logit_scale=100 in f32 after the matmul (more accurate, free
        # under the MXU-dominated epilogue).
        out_ref[...] = (100.0 * logits).astype(out_ref.dtype)


def classification_model(images_nchw, w_proj, text_features,
                         *, compute_dtype=jnp.bfloat16, tk=None):
    """images_nchw: (B, C, H, W); w_proj: (C*H*W, D); text_features: (D, N)."""
    B = images_nchw.shape[0]
    K = math.prod(images_nchw.shape[1:])
    D = w_proj.shape[1]
    N = text_features.shape[1]

    lane_mult, phys_vmem = _device_budget()
    itemsize = jnp.dtype(compute_dtype).itemsize

    # bf16 packs 2 rows per sublane -> minimum dense bf16 tile is (16, 128).
    row_mult = 16 if itemsize <= 2 else 8

    D_pad = _round_up(D, lane_mult)
    N_pad = _round_up(N, lane_mult)

    # Larger batch tiles reduce how many times the full W panel is re-streamed
    # from HBM (its index_map ignores the batch axis).
    B_pad = _round_up(B, row_mult)
    tb = min(256, B_pad)
    B_pad = _round_up(B_pad, tb)

    K_aligned = _round_up(K, 128)

    # --- per-generation VMEM accounting --------------------------------
    def vmem_usage(tk_):
        return (2 * tb * tk_ * itemsize          # x tile, double-buffered
                + 2 * tk_ * D_pad * itemsize     # w tile, double-buffered
                + 1 * D_pad * N_pad * itemsize   # t resident, single-buffered
                + 2 * tb * N_pad * 4             # output tile (f32), dbl-buf
                + tb * D_pad * 4)                # f32 feature accumulator

    budget = phys_vmem - 24 * 1024 * 1024        # headroom for compiler scratch
    if tk is None:
        tk = 128
        for cand in (2048, 1024, 512, 256, 128):
            c = min(cand, K_aligned)
            if vmem_usage(c) <= budget:
                tk = c
                break
    tk = _round_up(min(tk, K_aligned), 128)
    K_pad = _round_up(K, tk)

    used = vmem_usage(tk)
    vmem_limit = min(phys_vmem - 8 * 1024 * 1024,
                     max(32 * 1024 * 1024, used + 8 * 1024 * 1024))

    # --- cast to compute dtype first, then pad (skip no-op pads) --------
    x_p = _pad2d(images_nchw.reshape(B, K).astype(compute_dtype), B_pad, K_pad)
    w_p = _pad2d(w_proj.astype(compute_dtype), K_pad, D_pad)
    t_p = _pad2d(text_features.astype(compute_dtype), D_pad, N_pad)

    grid = (B_pad // tb, K_pad // tk)  # K (reduction) is the last grid axis.
    n_btiles = grid[0]

    cost = pl.CostEstimate(
        flops=2 * B_pad * K_pad * D_pad + 2 * B_pad * D_pad * N_pad,
        transcendentals=B_pad,
        bytes_accessed=(x_p.size * x_p.dtype.itemsize
                        + w_p.size * w_p.dtype.itemsize * n_btiles  # re-streamed
                        + t_p.size * t_p.dtype.itemsize
                        + B_pad * N_pad * 4),
    )

    out_pad = pl.pallas_call(
        _classification_kernel,
        out_shape=jax.ShapeDtypeStruct((B_pad, N_pad), jnp.float32),
        grid_spec=pltpu.PrefetchScalarGridSpec(
            num_scalar_prefetch=0,
            grid=grid,
            in_specs=[
                # x: stream (tb, tk) tiles across batch and K.
                pl.BlockSpec((tb, tk), lambda b, k: (b, k)),
                # w_proj: stream (tk, D_pad) tiles across K, re-used per batch.
                pl.BlockSpec((tk, D_pad), lambda b, k: (k, 0)),
                # text_features: constant index_map -> single resident buffer.
                pl.BlockSpec((D_pad, N_pad), lambda b, k: (0, 0),
                             pipeline_mode=pl.Buffered(1)),
            ],
            # Output block revisited across K: accumulator pattern, written
            # once at k==last.
            out_specs=pl.BlockSpec((tb, N_pad), lambda b, k: (b, 0)),
            scratch_shapes=[pltpu.VMEM((tb, D_pad), jnp.float32)],
        ),
        compiler_params=pltpu.CompilerParams(
            dimension_semantics=("parallel", "arbitrary"),
            vmem_limit_bytes=int(vmem_limit),
        ),
        cost_estimate=cost,
    )(x_p, w_p, t_p)

    return out_pad[:B, :N]


if __name__ == "__main__":
    # Small shapes: batch=2, channels=4, spatial=16x16, embed dim=32, classes=8
    B, C, H, W = 2, 4, 16, 16
    D, N = 32, 8
    K = C * H * W

    key = jax.random.PRNGKey(0)
    k_img, k_proj, k_text = jax.random.split(key, 3)

    images = jax.random.normal(k_img, (B, C, H, W), dtype=jnp.float32)
    w_proj = jax.random.normal(k_proj, (K, D), dtype=jnp.float32) * 0.02
    text_features = jax.random.normal(k_text, (D, N), dtype=jnp.float32) * 0.1

    logits = classification_model(images, w_proj, text_features)
    logits = jax.block_until_ready(logits)

    # Pure-JAX f32 reference (module semantics). The kernel uses bf16 MXU
    # operands with f32 accumulation, so allow ~1e-2 relative tolerance.
    feats_ref = images.reshape(B, K) @ w_proj
    feats_ref = feats_ref / jnp.linalg.norm(feats_ref, axis=-1, keepdims=True)
    logits_ref = 100.0 * (feats_ref @ text_features)

    assert logits.shape == (B, N)
    max_err = float(jnp.max(jnp.abs(logits - logits_ref)))
    assert jnp.allclose(logits, logits_ref, atol=2e-1, rtol=3e-2), max_err

    print("KERNEL_OK")
</pallas_src>

<mosaic_0001>
module attributes {stable_mosaic.version = 11 : i64} {
  func.func @_classification_kernel(%arg0: i32, %arg1: i32, %arg2: memref<16x1024xbf16, #tpu.memory_space<vmem>>, %arg3: memref<1024x128xbf16, #tpu.memory_space<vmem>>, %arg4: memref<128x128xbf16, #tpu.memory_space<vmem>>, %arg5: memref<16x128xf32, #tpu.memory_space<vmem>>, %arg6: memref<16x128xf32, #tpu.memory_space<vmem>>) attributes {dimension_semantics = [#tpu.dimension_semantics<parallel>, #tpu.dimension_semantics<arbitrary>], iteration_bounds = array<i64: 1, 1>, scalar_prefetch = 0 : i64, scratch_operands = 1 : i64, tpu.core_type = #tpu.core_type<tc>, window_params = [{transform_indices = @transform_0, window_bounds = array<i64: 16, 1024>}, {transform_indices = @transform_1, window_bounds = array<i64: 1024, 128>}, {pipeline_mode = #tpu.pipeline_mode<synchronous>, transform_indices = @transform_2, window_bounds = array<i64: 128, 128>}, {transform_indices = @transform_3, window_bounds = array<i64: 16, 128>}]} {
    %c0_i32 = arith.constant 0 : i32
    %0 = arith.cmpi eq, %arg1, %c0_i32 : i32
    %1 = arith.extui %0 : i1 to i32
    %c0_i32_0 = arith.constant 0 : i32
    %2 = arith.cmpi ne, %1, %c0_i32_0 : i32
    scf.if %2 {
      %cst_10 = arith.constant 0.000000e+00 : f32
      %12 = vector.broadcast %cst_10 : f32 to vector<16x128xf32>
      %c0_11 = arith.constant 0 : index
      %c0_12 = arith.constant 0 : index
      %13 = vector.load %arg6[%c0_11, %c0_12] : memref<16x128xf32, #tpu.memory_space<vmem>>, vector<16x128xf32>
      tpu.vector_store %arg6[%c0_11, %c0_12], %12 {strides = array<i32>} : memref<16x128xf32, #tpu.memory_space<vmem>>, vector<16x128xf32>,
    } else {
    }
    %c0 = arith.constant 0 : index
    %c0_1 = arith.constant 0 : index
    %3 = vector.load %arg6[%c0, %c0_1] : memref<16x128xf32, #tpu.memory_space<vmem>>, vector<16x128xf32>
    %c0_2 = arith.constant 0 : index
    %c0_3 = arith.constant 0 : index
    %4 = vector.load %arg2[%c0_2, %c0_3] : memref<16x1024xbf16, #tpu.memory_space<vmem>>, vector<16x1024xbf16>
    %c0_4 = arith.constant 0 : index
    %c0_5 = arith.constant 0 : index
    %5 = vector.load %arg3[%c0_4, %c0_5] : memref<1024x128xbf16, #tpu.memory_space<vmem>>, vector<1024x128xbf16>
    %cst = arith.constant dense<0.000000e+00> : vector<16x128xf32>
    %6 = tpu.matmul %4, %5, %cst {dimension_numbers = #tpu.dot_dimension_numbers<[1], [0], [0], [1], [0, 0, 1, 1], [], []>} : vector<16x1024xbf16>, vector<1024x128xbf16>, vector<16x128xf32> -> vector<16x128xf32>
    %7 = arith.addf %3, %6 : vector<16x128xf32>
    %c0_6 = arith.constant 0 : index
    %c0_7 = arith.constant 0 : index
    %8 = vector.load %arg6[%c0_6, %c0_7] : memref<16x128xf32, #tpu.memory_space<vmem>>, vector<16x128xf32>
    tpu.vector_store %arg6[%c0_6, %c0_7], %7 {strides = array<i32>} : memref<16x128xf32, #tpu.memory_space<vmem>>, vector<16x128xf32>,
    %c0_i32_8 = arith.constant 0 : i32
    %9 = arith.cmpi eq, %arg1, %c0_i32_8 : i32
    %10 = arith.extui %9 : i1 to i32
    %c0_i32_9 = arith.constant 0 : i32
    %11 = arith.cmpi ne, %10, %c0_i32_9 : i32
    scf.if %11 {
      %c0_10 = arith.constant 0 : index
      %c0_11 = arith.constant 0 : index
      %12 = vector.load %arg6[%c0_10, %c0_11] : memref<16x128xf32, #tpu.memory_space<vmem>>, vector<16x128xf32>
      %13 = arith.mulf %12, %12 : vector<16x128xf32>
      %cst_12 = arith.constant dense<0.000000e+00> : vector<16xf32>
      %14 = vector.multi_reduction <add>, %13, %cst_12 [1] : vector<16x128xf32> to vector<16xf32>
      %15 = vector.shape_cast %14 : vector<16xf32> to vector<16x1xf32>
      %cst_13 = arith.constant 9.99999996E-13 : f32
      %16 = vector.broadcast %cst_13 : f32 to vector<16x1xf32>
      %17 = arith.maximumf %15, %16 : vector<16x1xf32>
      %18 = math.rsqrt %17 : vector<16x1xf32>
      %19 = vector.broadcast %18 : vector<16x1xf32> to vector<16x128xf32>
      %20 = arith.mulf %12, %19 : vector<16x128xf32>
      %21 = arith.truncf %20 : vector<16x128xf32> to vector<16x128xbf16>
      %c0_14 = arith.constant 0 : index
      %c0_15 = arith.constant 0 : index
      %22 = vector.load %arg4[%c0_14, %c0_15] : memref<128x128xbf16, #tpu.memory_space<vmem>>, vector<128x128xbf16>
      %cst_16 = arith.constant dense<0.000000e+00> : vector<16x128xf32>
      %23 = tpu.matmul %21, %22, %cst_16 {dimension_numbers = #tpu.dot_dimension_numbers<[1], [0], [0], [1], [0, 0, 1, 1], [], []>} : vector<16x128xbf16>, vector<128x128xbf16>, vector<16x128xf32> -> vector<16x128xf32>
      %cst_17 = arith.constant 1.000000e+02 : f32
      %24 = vector.broadcast %cst_17 : f32 to vector<16x128xf32>
      %25 = arith.mulf %24, %23 : vector<16x128xf32>
      %c0_18 = arith.constant 0 : index
      %c0_19 = arith.constant 0 : index
      %26 = vector.load %arg5[%c0_18, %c0_19] : memref<16x128xf32, #tpu.memory_space<vmem>>, vector<16x128xf32>
      tpu.vector_store %arg5[%c0_18, %c0_19], %25 {strides = array<i32>} : memref<16x128xf32, #tpu.memory_space<vmem>>, vector<16x128xf32>,
    } else {
    }
    return
  }
  func.func @transform_0(%arg0: i32, %arg1: i32) -> (i32, i32) {
    %c0_i32 = arith.constant 0 : i32
    return %arg0, %arg1 : i32, i32
  }
  func.func @transform_1(%arg0: i32, %arg1: i32) -> (i32, i32) {
    %c0_i32 = arith.constant 0 : i32
    %c0_i32_0 = arith.constant 0 : i32
    return %arg1, %c0_i32 : i32, i32
  }
  func.func @transform_2(%arg0: i32, %arg1: i32) -> (i32, i32) {
    %c0_i32 = arith.constant 0 : i32
    %c0_i32_0 = arith.constant 0 : i32
    %c0_i32_1 = arith.constant 0 : i32
    return %c0_i32, %c0_i32_0 : i32, i32
  }
  func.func @transform_3(%arg0: i32, %arg1: i32) -> (i32, i32) {
    %c0_i32 = arith.constant 0 : i32
    %c0_i32_0 = arith.constant 0 : i32
    return %arg0, %c0_i32 : i32, i32
  }
}

</mosaic_0001>

<bundles_post_ra>
// kernel: tpu_custom_call.1
= control target key start
LH: loop header
LB: loop body
LE: loop exit
PB: predicated region body
PF: predicated region fallthrough
CT: control target
= control target key end

     0   :  { %8 = vsyncpa [#allocation4], 0  ;;  %s1353_s0 = inlined_call_operand.hbm [shape: bf16[16,1024], index: 0, kind: input, shape index: {}]   ;;  %s1354_s1 = inlined_call_operand.hbm [shape: bf16[1024,128], index: 1, kind: input, shape index: {}]   ;;  %s1355_s2 = inlined_call_operand.hbm [shape: bf16[128,128], index: 2, kind: input, shape index: {}]   ;;  %s1356_s3 = inlined_call_operand.hbm [shape: f32[16,128], index: 3, kind: output, shape index: {}]  }
   0x1   :  { %9 = vsyncpa [#allocation7], 0 }
   0x2   :  { %10 = vsyncpa [#allocation5], 0  ;;  %s1309_s12 = smov [#allocation6]  }
   0x3   :  { %s28_s13 = sshll.u32 %s1309_s12, 4  ;;  %s29_s13 = int_to_ptr.vmem [resolvable:$true] %s28_s13 }
   0x4   :  { %s1231_s14 = scalar_lea.vmem %s29_s13, 8192  ;;  %p1236_p1 = scmp.lt.s32.totalorder %s29_s13, %s29_s13 }
   0x5   :  { %p1232_p0 = scmp.ne.s32.totalorder %s29_s13, %s1231_s14  ;;  %p1237_p2 = scmp.lt.s32.totalorder %s1231_s14, %s1231_s14 }
   0x7   :  { %p1238_p3 = por %p1237_p2, %p1236_p1 }
   0x9   :  { %p1239_p4 = pnand %p1238_p3, %p1232_p0 }
   0xb   :  { %1242 = shalt.err (!%p1239_p4)
}
   0xc   :  { %s1310_s15 = smov 64   ;;  %s1311_s16 = smov 4  }
   0xd   :  { %34 = dma.hbm_to_vmem [thread:$0]  %s1354_s1, 8192, %s29_s13, [#allocation7], %s1310_s15, %s1310_s15, %s1311_s16  }
   0xe   :  { %s1312_s19 = smov [#allocation3]  }
   0xf   :  { %s16_s20 = sshll.u32 %s1312_s19, 4  ;;  %s17_s20 = int_to_ptr.vmem [resolvable:$true] %s16_s20 }
  0x10   :  { %s1251_s21 = scalar_lea.vmem %s17_s20, 1024  ;;  %p1256_p6 = scmp.lt.s32.totalorder %s17_s20, %s17_s20 }
  0x11   :  { %p1252_p5 = scmp.ne.s32.totalorder %s17_s20, %s1251_s21  ;;  %p1257_p7 = scmp.lt.s32.totalorder %s1251_s21, %s1251_s21 }
  0x13   :  { %p1258_p8 = por %p1257_p7, %p1256_p6 }
  0x15   :  { %p1259_p9 = pnand %p1258_p8, %p1252_p5 }
  0x17   :  { %1262 = shalt.err (!%p1259_p9)
}
  0x18   :  { %s1313_s22 = smov 512   ;;  %s1314_s23 = smov 32  }
  0x19   :  { %22 = dma.hbm_to_vmem [thread:$0]  %s1353_s0, 1024, %s17_s20, [#allocation4], %s1313_s22, %s1313_s22, %s1314_s23  }
  0x1a   :  { %s1315_s26 = smov [#allocation8]  }
  0x1b   :  { %s40_s27 = sshll.u32 %s1315_s26, 4  ;;  %s41_s27 = int_to_ptr.vmem [resolvable:$true] %s40_s27 }
  0x1c   :  { %s1271_s1 = scalar_lea.vmem %s41_s27, 1024  ;;  %p1276_p11 = scmp.lt.s32.totalorder %s41_s27, %s41_s27 }
  0x1d   :  { %p1272_p10 = scmp.ne.s32.totalorder %s41_s27, %s1271_s1  ;;  %p1277_p12 = scmp.lt.s32.totalorder %s1271_s1, %s1271_s1 }
  0x1f   :  { %p1278_p13 = por %p1277_p12, %p1276_p11 }
  0x21   :  { %p1279_p0 = pnand %p1278_p13, %p1272_p10 }
  0x23   :  { %1282 = shalt.err (!%p1279_p0)
}
  0x24   :  { %46 = dma.hbm_to_vmem [thread:$0]  %s1355_s2, 1024, %s41_s27, [#allocation7], %s1310_s15, %s1310_s15, %s1311_s16  }
  0x25   :  { %1303 = dma.done.wait [#allocation4], 1024  }
  0x26   :  { %1304 = vsyncadd [#allocation4], 4294966272 }
  0x27   :  { %1305 = dma.done.wait [#allocation7], 9216  }
  0x28   :  { %1306 = vsyncadd [#allocation7], 4294958080  ;;  %v1147_v0 = vld [vmem:[#allocation6 + $0x78] sm:$0xff]   ;;  %v1151_v4 = vld [vmem:[#allocation6 + $0x70] sm:$0xff]   ;;  %vm1317_vm0 = vmmov 0   ;;  %s1318_s0 = smov [#allocation9]  }
  0x29   :  { %v1148_v1 = vld [vmem:[#allocation6 + $0xf8] sm:$0xff]   ;;  %1018 = vmatprep.subr.bf16.mxu0 %v1147_v0  ;;  %v1152_v5 = vld [vmem:[#allocation6 + $0xf0] sm:$0xff]   ;;  %v1155_v8 = vld [vmem:[#allocation6 + $0x68] sm:$0xff]   ;;  %s925_s2 = sshll.u32 %s1318_s0, 4  ;;  %s926_s2 = int_to_ptr.vmem [resolvable:$true] %s925_s2 }
  0x2a   :  { %v1149_v2 = vld [vmem:[#allocation6 + $0x38] sm:$0xff]   ;;  %1040 = vmatprep.subr.bf16.mxu1 %v1148_v1  ;;  %v1153_v6 = vld [vmem:[#allocation6 + $0x30] sm:$0xff]   ;;  %v1156_v9 = vld [vmem:[#allocation6 + $0xe8] sm:$0xff]   ;;  %s1283_s30 = scalar_lea.vmem %s926_s2, 256  ;;  %p1288_p2 = scmp.lt.s32.totalorder %s926_s2, %s926_s2 }
  0x2b   :  { %v1150_v3 = vld [vmem:[#allocation6 + $0xb8] sm:$0xff]   ;;  %1019 = vmatpush3.bf16.msra.mxu0 %v1149_v2  ;;  %v1154_v7 = vld [vmem:[#allocation6 + $0xb0] sm:$0xff]   ;;  %v1157_v10 = vld [vmem:[#allocation6 + $0x28] sm:$0xff]   ;;  %p1284_p1 = scmp.ne.s32.totalorder %s926_s2, %s1283_s30  ;;  %p1289_p3 = scmp.lt.s32.totalorder %s1283_s30, %s1283_s30 }
  0x2c   :  { %1041 = vmatpush3.bf16.msra.mxu1 %v1150_v3  ;;  %1020 = vmatprep.subr.bf16.mxu0 %v1151_v4  ;;  %v1158_v11 = vld [vmem:[#allocation6 + $0xa8] sm:$0xff]   ;;  %v1159_v12 = vld [vmem:[#allocation6 + $0x60] sm:$0xff]   ;;  %v1163_v16 = vld [vmem:[#allocation6 + $0x58] sm:$0xff]  }
  0x2d   :  { %1042 = vmatprep.subr.bf16.mxu1 %v1152_v5  ;;  %v1160_v13 = vld [vmem:[#allocation6 + $0xe0] sm:$0xff]   ;;  %v1164_v17 = vld [vmem:[#allocation6 + $0xd8] sm:$0xff]   ;;  %v1167_v20 = vld [vmem:[#allocation6 + $0x50] sm:$0xff]   ;;  %p1290_p4 = por %p1289_p3, %p1288_p2 }
  0x2e   :  { %v1161_v14 = vld [vmem:[#allocation6 + $0x20] sm:$0xff]   ;;  %v1165_v18 = vld [vmem:[#allocation6 + $0x18] sm:$0xff]   ;;  %v1168_v21 = vld [vmem:[#allocation6 + $0xd0] sm:$0xff]  }
  0x2f   :  { %1021 = vmatpush3.bf16.msra.mxu0 %v1153_v6  ;;  %v1162_v15 = vld [vmem:[#allocation6 + $0xa0] sm:$0xff]   ;;  %v1166_v19 = vld [vmem:[#allocation6 + $0x98] sm:$0xff]   ;;  %v1169_v22 = vld [vmem:[#allocation6 + $0x10] sm:$0xff]   ;;  %p1291_p5 = pnand %p1290_p4, %p1284_p1 }
  0x30   :  { %1043 = vmatpush3.bf16.msra.mxu1 %v1154_v7  ;;  %1022 = vmatprep.subr.bf16.mxu0 %v1155_v8  ;;  %v1170_v23 = vld [vmem:[#allocation6 + $0x90] sm:$0xff]   ;;  %v1171_v24 = vld [vmem:[#allocation6 + $0x48] sm:$0xff]   ;;  %v1175_v28 = vld [vmem:[#allocation6 + $0x40] sm:$0xff]  }
  0x31   :  { %1044 = vmatprep.subr.bf16.mxu1 %v1156_v9  ;;  %v1172_v25 = vld [vmem:[#allocation6 + $0xc8] sm:$0xff]   ;;  %v1176_v29 = vld [vmem:[#allocation6 + $0xc0] sm:$0xff]   ;;  %v1179_v40 = vld [vmem:[#allocation6 + $0x178] sm:$0xff]  }
  0x32   :  { %v1173_v26 = vld [vmem:[#allocation6 + $0x8] sm:$0xff]   ;;  %v1177_v30 = vld [vmem:[#allocation6] sm:$0xff]   ;;  %v1180_v41 = vld [vmem:[#allocation6 + $0x1f8] sm:$0xff]  }
  0x33   :  { %1023 = vmatpush3.bf16.msra.mxu0 %v1157_v10  ;;  %v1174_v27 = vld [vmem:[#allocation6 + $0x88] sm:$0xff]   ;;  %v1178_v31 = vld [vmem:[#allocation6 + $0x80] sm:$0xff]   ;;  %v1181_v42 = vld [vmem:[#allocation6 + $0x138] sm:$0xff]  }
  0x34   :  { %1045 = vmatpush3.bf16.msra.mxu1 %v1158_v11  ;;  %1024 = vmatprep.subr.bf16.mxu0 %v1159_v12  ;;  %v65_v32 = vld [vmem:[#allocation3] sm:$0xff]  ;;  %v66_v34 = vld [vmem:[#allocation3 + $0x8] sm:$0xff]  ;;  %v1182_v43 = vld [vmem:[#allocation6 + $0x1b8] sm:$0xff]  }
  0x35   :  { %1046 = vmatprep.subr.bf16.mxu1 %v1160_v13  ;;  %v69_v33 = vld [vmem:[#allocation3 + $0x20] sm:$0xff]  ;;  %v70_v37 = vld [vmem:[#allocation3 + $0x28] sm:$0xff]  ;;  %v1183_v44 = vld [vmem:[#allocation6 + $0x170] sm:$0xff]  }
  0x36   :  { %v938_v35 = vcombine.low %v65_v32, %v69_v33  ;;  %v939_v36 = vcombine.high %v65_v32, %v69_v33  ;;  %v940_v38 = vcombine.low %v66_v34, %v70_v37  ;;  %v941_v39 = vcombine.high %v66_v34, %v70_v37  ;;  %v1184_v45 = vld [vmem:[#allocation6 + $0x1f0] sm:$0xff]   ;;  %v1187_v48 = vld [vmem:[#allocation6 + $0x168] sm:$0xff]   ;;  %v1191_v52 = vld [vmem:[#allocation6 + $0x160] sm:$0xff]  }
  0x37   :  { %1025 = vmatpush3.bf16.msra.mxu0 %v1161_v14  ;;  %v1185_v46 = vld [vmem:[#allocation6 + $0x130] sm:$0xff]   ;;  %v1188_v49 = vld [vmem:[#allocation6 + $0x1e8] sm:$0xff]   ;;  %v1192_v53 = vld [vmem:[#allocation6 + $0x1e0] sm:$0xff]  }
  0x38   :  { %1047 = vmatpush3.bf16.msra.mxu1 %v1162_v15  ;;  %1026 = vmatprep.subr.bf16.mxu0 %v1163_v16  ;;  %v1186_v47 = vld [vmem:[#allocation6 + $0x1b0] sm:$0xff]   ;;  %v1189_v50 = vld [vmem:[#allocation6 + $0x128] sm:$0xff]   ;;  %v1193_v54 = vld [vmem:[#allocation6 + $0x120] sm:$0xff]  }
  0x39   :  { %1048 = vmatprep.subr.bf16.mxu1 %v1164_v17  ;;  %657 = vmatprep.mubr.bf16.mxu0 %v939_v36  ;;  %v1190_v51 = vld [vmem:[#allocation6 + $0x1a8] sm:$0xff]   ;;  %v1194_v55 = vld [vmem:[#allocation6 + $0x1a0] sm:$0xff]   ;;  %v1195_v56 = vld [vmem:[#allocation6 + $0x158] sm:$0xff]   ;;  %v1316_v17 = vmov 0.0  }
  0x3a   :  { %698 = vmatprep.mubr.bf16.mxu1 %v941_v39  ;;  %v1196_v57 = vld [vmem:[#allocation6 + $0x1d8] sm:$0xff]   ;;  %v1199_v60 = vld [vmem:[#allocation6 + $0x150] sm:$0xff]   ;;  %v1203_v0 = vld [vmem:[#allocation6 + $0x148] sm:$0xff]  }
  0x3b   :  { %1027 = vmatpush3.bf16.msra.mxu0 %v1165_v18  ;;  %v1197_v58 = vld [vmem:[#allocation6 + $0x118] sm:$0xff]   ;;  %v1200_v61 = vld [vmem:[#allocation6 + $0x1d0] sm:$0xff]   ;;  %v1204_v1 = vld [vmem:[#allocation6 + $0x1c8] sm:$0xff]  }
  0x3c   :  { %1049 = vmatpush3.bf16.msra.mxu1 %v1166_v19  ;;  %1028 = vmatprep.subr.bf16.mxu0 %v1167_v20  ;;  %v1198_v59 = vld [vmem:[#allocation6 + $0x198] sm:$0xff]   ;;  %v1201_v62 = vld [vmem:[#allocation6 + $0x110] sm:$0xff]   ;;  %v1205_v2 = vld [vmem:[#allocation6 + $0x108] sm:$0xff]  }
  0x3d   :  { %1050 = vmatprep.subr.bf16.mxu1 %v1168_v21  ;;  %v1202_v63 = vld [vmem:[#allocation6 + $0x190] sm:$0xff]   ;;  %v1206_v3 = vld [vmem:[#allocation6 + $0x188] sm:$0xff]   ;;  %v1207_v4 = vld [vmem:[#allocation6 + $0x140] sm:$0xff]  }
  0x3e   :  { %v1208_v5 = vld [vmem:[#allocation6 + $0x1c0] sm:$0xff]   ;;  %v67_v8 = vld [vmem:[#allocation3 + $0x10] sm:$0xff]  ;;  %v68_v12 = vld [vmem:[#allocation3 + $0x18] sm:$0xff] }
  0x3f   :  { %1029 = vmatpush3.bf16.msra.mxu0 %v1169_v22  ;;  %v1209_v6 = vld [vmem:[#allocation6 + $0x100] sm:$0xff]   ;;  %v71_v9 = vld [vmem:[#allocation3 + $0x30] sm:$0xff]  ;;  %v72_v13 = vld [vmem:[#allocation3 + $0x38] sm:$0xff] }
  0x40   :  { %1051 = vmatpush3.bf16.msra.mxu1 %v1170_v23  ;;  %1030 = vmatprep.subr.bf16.mxu0 %v1171_v24  ;;  %v1210_v7 = vld [vmem:[#allocation6 + $0x180] sm:$0xff]   ;;  %v942_v10 = vcombine.low %v67_v8, %v71_v9  ;;  %v943_v11 = vcombine.high %v67_v8, %v71_v9  ;;  %v944_v14 = vcombine.low %v68_v12, %v72_v13  ;;  %v1211_v16 = vld [vmem:[#allocation8 + $0x38] sm:$0xff]   ;;  %v1212_v18 = vld [vmem:[#allocation8 + $0x30] sm:$0xff]  }
  0x41   :  { %1052 = vmatprep.subr.bf16.mxu1 %v1172_v25  ;;  %v945_v15 = vcombine.high %v68_v12, %v72_v13 }
  0x43   :  { %1031 = vmatpush3.bf16.msra.mxu0 %v1173_v26 }
  0x44   :  { %1053 = vmatpush3.bf16.msra.mxu1 %v1174_v27  ;;  %1032 = vmatprep.subr.bf16.mxu0 %v1175_v28 }
  0x45   :  { %1054 = vmatprep.subr.bf16.mxu1 %v1176_v29 }
  0x47   :  { %1033 = vmatpush3.bf16.msra.mxu0 %v1177_v30 }
  0x48   :  { %1055 = vmatpush3.bf16.msra.mxu1 %v1178_v31  ;;  %1062 = vmatprep.subr.bf16.mxu0 %v1179_v40 }
  0x49   :  { %1084 = vmatprep.subr.bf16.mxu1 %v1180_v41 }
  0x4a   :  { %658 = vmatmul.mubr.bf16.vlgmr.msra.gmra.mxu0 %v938_v35 }
  0x4b   :  { %699 = vmatmul.mubr.bf16.vlgmr.msra.gmra.mxu1 %v940_v38  ;;  %1063 = vmatpush3.bf16.msra.mxu0 %v1181_v42 }
  0x4c   :  { %1085 = vmatpush3.bf16.msra.mxu1 %v1182_v43  ;;  %1064 = vmatprep.subr.bf16.mxu0 %v1183_v44 }
  0x4d   :  { %1086 = vmatprep.subr.bf16.mxu1 %v1184_v45  ;;  %739 = vmatprep.mubr.bf16.mxu0 %v943_v11 }
  0x4e   :  { %780 = vmatprep.mubr.bf16.mxu1 %v945_v15 }
  0x4f   :  { %1065 = vmatpush3.bf16.msra.mxu0 %v1185_v46 }
  0x50   :  { %1087 = vmatpush3.bf16.msra.mxu1 %v1186_v47  ;;  %1066 = vmatprep.subr.bf16.mxu0 %v1187_v48 }
  0x51   :  { %1088 = vmatprep.subr.bf16.mxu1 %v1188_v49 }
  0x53   :  { %1067 = vmatpush3.bf16.msra.mxu0 %v1189_v50 }
  0x54   :  { %1089 = vmatpush3.bf16.msra.mxu1 %v1190_v51  ;;  %1068 = vmatprep.subr.bf16.mxu0 %v1191_v52  ;;  %v1213_v51 = vld [vmem:[#allocation8 + $0x28] sm:$0xff]   ;;  %v1214_v52 = vld [vmem:[#allocation8 + $0x20] sm:$0xff]  }
  0x55   :  { %1090 = vmatprep.subr.bf16.mxu1 %v1192_v53  ;;  %v1215_v53 = vld [vmem:[#allocation8 + $0x18] sm:$0xff]  }
  0x57   :  { %1069 = vmatpush3.bf16.msra.mxu0 %v1193_v54  ;;  %v1216_v54 = vld [vmem:[#allocation8 + $0x10] sm:$0xff]  }
  0x58   :  { %1091 = vmatpush3.bf16.msra.mxu1 %v1194_v55  ;;  %1070 = vmatprep.subr.bf16.mxu0 %v1195_v56  ;;  %v1217_v55 = vld [vmem:[#allocation8 + $0x8] sm:$0xff]   ;;  %v1218_v56 = vld [vmem:[#allocation8] sm:$0xff]  }
  0x59   :  { %1092 = vmatprep.subr.bf16.mxu1 %v1196_v57 }
  0x5b   :  { %1071 = vmatpush3.bf16.msra.mxu0 %v1197_v58 }
  0x5c   :  { %1093 = vmatpush3.bf16.msra.mxu1 %v1198_v59  ;;  %1072 = vmatprep.subr.bf16.mxu0 %v1199_v60 }
  0x5d   :  { %1094 = vmatprep.subr.bf16.mxu1 %v1200_v61 }
  0x5f   :  { %1073 = vmatpush3.bf16.msra.mxu0 %v1201_v62 }
  0x60   :  { %1095 = vmatpush3.bf16.msra.mxu1 %v1202_v63  ;;  %1074 = vmatprep.subr.bf16.mxu0 %v1203_v0 }
  0x61   :  { %1096 = vmatprep.subr.bf16.mxu1 %v1204_v1 }
  0x63   :  { %1075 = vmatpush3.bf16.msra.mxu0 %v1205_v2 }
  0x64   :  { %1097 = vmatpush3.bf16.msra.mxu1 %v1206_v3  ;;  %1076 = vmatprep.subr.bf16.mxu0 %v1207_v4 }
  0x65   :  { %1098 = vmatprep.subr.bf16.mxu1 %v1208_v5 }
  0x67   :  { %1077 = vmatpush3.bf16.msra.mxu0 %v1209_v6 }
  0x68   :  { %1099 = vmatpush3.bf16.msra.mxu1 %v1210_v7  ;;  %1115 = vmatprep.subr.bf16.mxu0 %v1316_v17 }
  0x6a   :  { %740 = vmatmul.mubr.bf16.vlgmr.msra.gmra.mxu0 %v942_v10 }
  0x6b   :  { %781 = vmatmul.mubr.bf16.vlgmr.msra.gmra.mxu1 %v944_v14  ;;  %1116 = vmatpush3.bf16.msra.mxu0 %v1211_v16 }
  0x6c   :  { %1117 = vmatprep.subr.bf16.mxu0 %v1316_v17  ;;  %1131 = vmatprep.mubr.msk.bf16.mxu0 %vm1317_vm0, %v1316_v17 }
  0x6f   :  { %1118 = vmatpush3.bf16.msra.mxu0 %v1212_v18 }
  0x70   :  { %1119 = vmatprep.subr.bf16.mxu0 %v1316_v17 }
  0x73   :  { %1120 = vmatpush3.bf16.msra.mxu0 %v1213_v51 }
  0x74   :  { %1121 = vmatprep.subr.bf16.mxu0 %v1316_v17 }
  0x77   :  { %1122 = vmatpush3.bf16.msra.mxu0 %v1214_v52 }
  0x78   :  { %1123 = vmatprep.subr.bf16.mxu0 %v1316_v17 }
  0x7b   :  { %1124 = vmatpush3.bf16.msra.mxu0 %v1215_v53 }
  0x7c   :  { %1125 = vmatprep.subr.bf16.mxu0 %v1316_v17 }
  0x7f   :  { %1126 = vmatpush3.bf16.msra.mxu0 %v1216_v54 }
  0x80   :  { %1127 = vmatprep.subr.bf16.mxu0 %v1316_v17 }
  0x83   :  { %1128 = vmatpush3.bf16.msra.mxu0 %v1217_v55 }
  0x84   :  { %1129 = vmatprep.subr.bf16.mxu0 %v1316_v17 }
  0x87   :  { %1130 = vmatpush3.bf16.msra.mxu0 %v1218_v56 }
 0x10a   :  { %v1034_v19 = vpop.f32.mrf.mxu0 }
 0x10b   :  { %v1056_v20 = vpop.f32.mrf.mxu1 }
 0x10c   :  { %v1035_v21 = vpop.f32.mrf.mxu0 }
 0x10d   :  { %v1057_v22 = vpop.f32.mrf.mxu1  ;;  %v1036_v26 = vadd.f32 %v1035_v21, %v1034_v19 }
 0x10e   :  { %v1037_v23 = vpop.f32.mrf.mxu0  ;;  %v1058_v27 = vadd.f32 %v1057_v22, %v1056_v20 }
 0x10f   :  { %v1059_v24 = vpop.f32.mrf.mxu1 }
 0x110   :  { %v1038_v25 = vpop.f32.mrf.mxu0  ;;  %v701_v32 = vadd.f32 %v1058_v27, %v1036_v26 }
 0x111   :  { %v1060_v28 = vpop.f32.mrf.mxu1  ;;  %v1039_v33 = vadd.f32 %v1038_v25, %v1037_v23 }
 0x112   :  { %v1061_v34 = vadd.f32 %v1060_v28, %v1059_v24 }
 0x114   :  { %v704_v42 = vadd.f32 %v1061_v34, %v1039_v33 }
 0x12a   :  { %v1078_v29 = vpop.f32.mrf.mxu0 }
 0x12b   :  { %v1100_v30 = vpop.f32.mrf.mxu1 }
 0x12c   :  { %v1079_v31 = vpop.f32.mrf.mxu0 }
 0x12d   :  { %v1080_v35 = vadd.f32 %v1079_v31, %v1078_v29  ;;  %v1101_v36 = vpop.f32.mrf.mxu1 }
 0x12e   :  { %v1081_v37 = vpop.f32.mrf.mxu0  ;;  %v1102_v39 = vadd.f32 %v1101_v36, %v1100_v30 }
 0x12f   :  { %v742_v38 = vadd.f32 %v1080_v35, %v701_v32  ;;  %v1103_v40 = vpop.f32.mrf.mxu1 }
 0x130   :  { %v1082_v41 = vpop.f32.mrf.mxu0 }
 0x131   :  { %v1083_v43 = vadd.f32 %v1082_v41, %v1081_v37  ;;  %v1104_v44 = vpop.f32.mrf.mxu1  ;;  %v783_v45 = vadd.f32 %v1102_v39, %v742_v38 }
 0x132   :  { %v1105_v47 = vadd.f32 %v1104_v44, %v1103_v40 }
 0x133   :  { %v745_v46 = vadd.f32 %v1083_v43, %v704_v42  ;;  %v798_v48 = vmul.f32 %v783_v45, %v783_v45 }
 0x135   :  { %v786_v49 = vadd.f32 %v1105_v47, %v745_v46  ;;  %800 = vadd.xlane.f32.xlu0 %v798_v48 }
 0x137   :  { %v799_v50 = vmul.f32 %v786_v49, %v786_v49 }
 0x139   :  { %802 = vadd.xlane.f32.xlu0 %v799_v50 }
 0x1be   :  { %v801_v57 = vpop.xlane.xlu0 %800 }
 0x1bf   :  { %v804_v58 = vmax.f32 %v801_v57, 1e-12 }
 0x1c1   :  { %1219 = vrsqrt.f32 %v804_v58 }
 0x1c2   :  { %v803_v59 = vpop.xlane.xlu0 %802 }
 0x1c3   :  { %v805_v60 = vmax.f32 %v803_v59, 1e-12 }
 0x1c5   :  { %1221 = vrsqrt.f32 %v805_v60 }
 0x1ce   :  { %v1220_v61 = vpop.eup %1219 }
 0x1cf   :  { %v808_v63 = vmul.f32 %v1220_v61, %v783_v45 }
 0x1d2   :  { %v1222_v62 = vpop.eup %1221 }
 0x1d3   :  { %v809_v0 = vmul.f32 %v1222_v62, %v786_v49 }
 0x1d5   :  { %v810_v1 = vpack.c.bf16 %v809_v0, %v808_v63 }
 0x1d7   :  { %1132 = vmatmul.mubr.bf16.vlgmr.msra.gmra.mxu0 %v810_v1 }
 0x297   :  { %v909_v2 = vpop.f32.mrf.mxu0 }
 0x298   :  { %v916_v3 = vmul.f32 100.0, %v909_v2 }
 0x299   :  { %v1133_v4 = vpop.f32.mrf.mxu0 }
 0x29a   :  { %918 = vst [vmem:[#allocation9] sm:$0xff] %v916_v3 }
 0x29b   :  { %v912_v5 = vpop.f32.mrf.mxu0 }
 0x29c   :  { %v917_v6 = vmul.f32 100.0, %v912_v5 }
 0x29d   :  { %v1134_v7 = vpop.f32.mrf.mxu0 }
 0x29e   :  { %919 = vst [vmem:[#allocation9 + $0x8] sm:$0xff] %v917_v6 }
 0x29f   :  { %1294 = shalt.err (!%p1291_p5)
}
 0x2a0   :  { %s1319_s4 = smov 128   ;;  %s1320_s5 = smov 8  }
 0x2a1   :  { %931 = dma.vmem_to_hbm [thread:$0]  %s926_s2, 256, %s1356_s3, [#allocation5], %s1319_s4, %s1319_s4, %s1320_s5  }
 0x2a2   :  { %1307 = dma.done.wait [#allocation5], 256  }
 0x2a3   :  { %1308 = vsyncadd [#allocation5], 4294967040 }
 0x2a4   :  { %935 = vsyncpa [#allocation4], 1 }
 0x2a5   :  { %936 = vsyncpa [#allocation7], 1 }
 0x2a6   :  { %937 = vsyncpa [#allocation5], 1 }

</bundles_post_ra>
